<compile_context>
chip_gen: v6e
topology: v6e:2x2x1
jax: 0.10.0
libtpu: 0.0.40
codegen_flags: <defaults>
</compile_context>

<pallas_src>
import functools

import jax
import jax.numpy as jnp
import numpy as np
from jax import lax
from jax.experimental import pallas as pl
from jax.experimental.pallas import tpu as pltpu


_LANE = 128
_SUBLANE = 8
# Per x-block byte budget (per pipeline buffer). Keeps double-buffered
# in+out of the normalize pass under ~10 MiB, i.e. inside the v5e 16 MiB /
# v6e 32 MiB / v7x 32 MiB scoped-VMEM defaults without raising limits.
_BLOCK_BUDGET_BYTES = 2 * 1024 * 1024


def _pick_channel_block(pc, m, itemsize):
    """Proxy-channel block: multiple of 8 dividing PC (largest <= 64), else full PC."""
    for cand in (64, 32, 16, 8):
        if pc % cand == 0 and m * cand * _LANE * itemsize <= _BLOCK_BUDGET_BYTES:
            return cand
    if pc % _SUBLANE == 0:
        return _SUBLANE
    return pc  # block == full array dim is always legal (handles ragged PC)


def _pick_lane_block(hw, m, bc, itemsize):
    """Lane (H*W) tile: full HW if it fits the budget, else a large multiple of 128."""
    max_lanes = _BLOCK_BUDGET_BYTES // (m * bc * itemsize)
    max_lanes = max(_LANE, (max_lanes // _LANE) * _LANE)
    if hw <= max_lanes:
        return hw
    bl = max_lanes
    while bl >= _LANE:
        if hw % bl == 0:
            return bl  # evenly dividing tile -> no tail masking needed
        bl -= _LANE
    return max_lanes   # ragged tail; stats kernel masks it


def _stats_kernel(x_ref, mean_ref, rstd_ref, *, eps, bl, hw, m, total_count,
                  needs_mask):
    """Pass 1: per proxy-channel mean and rsqrt(biased var + eps).

    Grid (pc_blocks, hw_tiles); hw axis is 'arbitrary' and accumulates a
    running (mean, M2) per channel directly in the (bc, 1) output blocks,
    which stay resident in VMEM across the hw axis.
    """
    l = pl.program_id(1)
    x = x_ref[...].astype(jnp.float32)            # (m, bc, bl) logical block

    if needs_mask:
        lane = lax.broadcasted_iota(jnp.int32, x.shape, 2)
        valid = (l * bl + lane) < hw
        n_b = (jnp.minimum(bl, hw - l * bl) * m).astype(jnp.float32)
        xz = jnp.where(valid, x, 0.0)
    else:
        n_b = jnp.float32(bl * m)
        xz = x

    # Per-tile mean (reduce lanes on XLU, then the leading M axis on VPU).
    s = jnp.sum(xz, axis=2, keepdims=True)        # (m, bc, 1)
    tile_sum = jnp.sum(s, axis=0)                 # (bc, 1)
    tile_mean = tile_sum / n_b

    # Per-tile centered sum of squares.
    d = x - tile_mean
    if needs_mask:
        d = jnp.where(valid, d, 0.0)
    sq = jnp.sum(d * d, axis=2, keepdims=True)    # (m, bc, 1)
    tile_m2 = jnp.sum(sq, axis=0)                 # (bc, 1)

    @pl.when(l == 0)
    def _():
        mean_ref[...] = jnp.zeros_like(mean_ref)
        rstd_ref[...] = jnp.zeros_like(rstd_ref)   # holds running M2 until finalize

    # Chan et al. parallel-variance combine (numerically safe, single read of x).
    count_a = (l * (bl * m)).astype(jnp.float32)   # all previous tiles are full
    new_count = count_a + n_b
    w_new = n_b / new_count
    delta = tile_mean - mean_ref[...]
    mean_ref[...] = mean_ref[...] + delta * w_new
    rstd_ref[...] = rstd_ref[...] + tile_m2 + (delta * delta) * (count_a * w_new)

    @pl.when(l == pl.num_programs(1) - 1)
    def _():
        var = rstd_ref[...] * jnp.float32(1.0 / total_count)   # biased variance
        rstd_ref[...] = lax.rsqrt(var + eps)


def _norm_kernel(x_ref, scale_ref, shift_ref, o_ref):
    """Pass 2: o = x * scale + shift  (affine already folded into scale/shift)."""
    x = x_ref[...].astype(jnp.float32)             # (m, bc, bl)
    o_ref[...] = (x * scale_ref[...] + shift_ref[...]).astype(o_ref.dtype)


def ghost_bn2d_old(x, weight=None, bias=None, *,
                   virtual2actual_batch_size_ratio=2, affine=False, eps=1e-5):
    """Forward of GhostBN2D_Old in training mode (batch statistics)."""
    N, C, H, W = x.shape
    r = virtual2actual_batch_size_ratio
    if N % r != 0:
        raise RuntimeError("batch size must be divisible by the virtual ratio")
    M = N // r
    PC = r * C
    HW = H * W

    # Zero-copy view: (N, C, H, W) -> (M, r*C, H*W); the middle axis is exactly
    # the proxy-channel axis of x.reshape(M, r*C, H, W). No HBM transposes.
    xv = x.reshape(M, PC, HW)

    itemsize = jnp.dtype(x.dtype).itemsize
    bc = _pick_channel_block(PC, M, itemsize)
    bl = _pick_lane_block(HW, M, bc, itemsize)
    n_pc = PC // bc
    n_l = pl.cdiv(HW, bl)
    needs_mask = (HW % bl) != 0

    # ---- Pass 1: per proxy-channel mean / rstd ------------------------------
    # TODO(synk): with n_pc == 1 the stats pass runs on a single TensorCore on
    # v7x; the dominant normalize pass below still parallelizes over hw tiles.
    mean, rstd = pl.pallas_call(
        functools.partial(_stats_kernel, eps=float(eps), bl=bl, hw=HW, m=M,
                          total_count=M * HW, needs_mask=needs_mask),
        out_shape=(jax.ShapeDtypeStruct((PC, 1), jnp.float32),
                   jax.ShapeDtypeStruct((PC, 1), jnp.float32)),
        grid=(n_pc, n_l),
        in_specs=[pl.BlockSpec((M, bc, bl), lambda i, l: (0, i, l))],
        out_specs=[pl.BlockSpec((bc, 1), lambda i, l: (i, 0)),
                   pl.BlockSpec((bc, 1), lambda i, l: (i, 0))],
        compiler_params=pltpu.CompilerParams(
            dimension_semantics=("parallel", "arbitrary")),
    )(xv)

    # Fold (optional) affine into per-proxy-channel scale/shift: tiny PC-sized
    # math, proxy channel pc = ri*C + ci uses weight[ci] / bias[ci].
    if affine:
        w_pc = jnp.tile(weight.astype(jnp.float32), r).reshape(PC, 1)
        b_pc = jnp.tile(bias.astype(jnp.float32), r).reshape(PC, 1)
        scale = rstd * w_pc
        shift = b_pc - mean * scale
    else:
        scale = rstd
        shift = -mean * rstd

    # ---- Pass 2: normalize ---------------------------------------------------
    out3d = pl.pallas_call(
        _norm_kernel,
        out_shape=jax.ShapeDtypeStruct((M, PC, HW), x.dtype),
        grid=(n_pc, n_l),
        in_specs=[pl.BlockSpec((M, bc, bl), lambda i, l: (0, i, l)),
                  pl.BlockSpec((bc, 1), lambda i, l: (i, 0)),   # re-DMA'd only when i changes
                  pl.BlockSpec((bc, 1), lambda i, l: (i, 0))],
        out_specs=pl.BlockSpec((M, bc, bl), lambda i, l: (0, i, l)),
        compiler_params=pltpu.CompilerParams(
            dimension_semantics=("parallel", "parallel")),
    )(xv, scale, shift)

    # Zero-copy view back: (M, r*C, H*W) -> (N, C, H, W).
    return out3d.reshape(N, C, H, W)


def _reference(x, weight, bias, *, r=2, affine=False, eps=1e-5):
    """Pure-JAX reference mirroring the PyTorch module (training mode)."""
    N, C, H, W = x.shape
    proxy = x.reshape(N // r, r * C, H, W)
    mean = jnp.mean(proxy, axis=(0, 2, 3), keepdims=True)
    var = jnp.mean((proxy - mean) ** 2, axis=(0, 2, 3), keepdims=True)
    proxy = (proxy - mean) / jnp.sqrt(var + eps)
    out = proxy.reshape(N, C, H, W)
    if affine:
        out = out * weight.reshape(1, -1, 1, 1) + bias.reshape(1, -1, 1, 1)
    return out


if __name__ == "__main__":
    key = jax.random.PRNGKey(0)
    N, C, H, W = 2, 4, 16, 16
    ratio = 2

    x = jax.random.normal(key, (N, C, H, W), dtype=jnp.float32)

    # --- affine=False (module default; weight/bias are registered as None) ---
    fwd = jax.jit(functools.partial(
        ghost_bn2d_old, virtual2actual_batch_size_ratio=ratio,
        affine=False, eps=1e-5))
    out = jax.block_until_ready(fwd(x))
    ref = _reference(x, None, None, r=ratio, affine=False, eps=1e-5)
    np.testing.assert_allclose(np.asarray(out), np.asarray(ref),
                               rtol=1e-5, atol=1e-5)

    # --- affine=True path (weight/bias folded into scale/shift) ---
    kw, kb = jax.random.split(jax.random.PRNGKey(1))
    weight = jax.random.normal(kw, (C,), jnp.float32)
    bias = jax.random.normal(kb, (C,), jnp.float32)
    fwd_a = jax.jit(functools.partial(
        ghost_bn2d_old, virtual2actual_batch_size_ratio=ratio,
        affine=True, eps=1e-5))
    out_a = jax.block_until_ready(fwd_a(x, weight, bias))
    ref_a = _reference(x, weight, bias, r=ratio, affine=True, eps=1e-5)
    np.testing.assert_allclose(np.asarray(out_a), np.asarray(ref_a),
                               rtol=1e-5, atol=1e-5)

    # TODO(synk): eval-mode path (F.batch_norm with tracked running stats) and
    # the running-stat momentum updates are training-loop side effects not
    # produced by this forward; not implemented.
    print("KERNEL_OK")
</pallas_src>

<mosaic_0001>
module attributes {stable_mosaic.version = 11 : i64} {
  func.func @_stats_kernel(%arg0: i32, %arg1: i32, %arg2: memref<1x8x256xf32, #tpu.memory_space<vmem>>, %arg3: memref<8x1xf32, #tpu.memory_space<vmem>>, %arg4: memref<8x1xf32, #tpu.memory_space<vmem>>) attributes {dimension_semantics = [#tpu.dimension_semantics<parallel>, #tpu.dimension_semantics<arbitrary>], iteration_bounds = array<i64: 1, 1>, scalar_prefetch = 0 : i64, scratch_operands = 0 : i64, tpu.core_type = #tpu.core_type<tc>, window_params = [{transform_indices = @transform_0, window_bounds = array<i64: 1, 8, 256>}, {transform_indices = @transform_1, window_bounds = array<i64: 8, 1>}, {transform_indices = @transform_2, window_bounds = array<i64: 8, 1>}]} {
    %c0 = arith.constant 0 : index
    %c0_0 = arith.constant 0 : index
    %c0_1 = arith.constant 0 : index
    %0 = vector.load %arg2[%c0, %c0_0, %c0_1] : memref<1x8x256xf32, #tpu.memory_space<vmem>>, vector<1x8x256xf32>
    %cst = arith.constant dense<0.000000e+00> : vector<1x8xf32>
    %1 = vector.multi_reduction <add>, %0, %cst [2] : vector<1x8x256xf32> to vector<1x8xf32>
    %2 = vector.shape_cast %1 : vector<1x8xf32> to vector<1x8x1xf32>
    %cst_2 = arith.constant dense<0.000000e+00> : vector<8x1xf32>
    %3 = vector.multi_reduction <add>, %2, %cst_2 [0] : vector<1x8x1xf32> to vector<8x1xf32>
    %cst_3 = arith.constant 2.560000e+02 : f32
    %4 = vector.broadcast %cst_3 : f32 to vector<8x1xf32>
    %5 = arith.divf %3, %4 : vector<8x1xf32>
    %6 = vector.shape_cast %5 : vector<8x1xf32> to vector<1x8x1xf32>
    %7 = vector.broadcast %6 : vector<1x8x1xf32> to vector<1x8x256xf32>
    %8 = arith.subf %0, %7 : vector<1x8x256xf32>
    %9 = arith.mulf %8, %8 : vector<1x8x256xf32>
    %cst_4 = arith.constant dense<0.000000e+00> : vector<1x8xf32>
    %10 = vector.multi_reduction <add>, %9, %cst_4 [2] : vector<1x8x256xf32> to vector<1x8xf32>
    %11 = vector.shape_cast %10 : vector<1x8xf32> to vector<1x8x1xf32>
    %cst_5 = arith.constant dense<0.000000e+00> : vector<8x1xf32>
    %12 = vector.multi_reduction <add>, %11, %cst_5 [0] : vector<1x8x1xf32> to vector<8x1xf32>
    %c0_i32 = arith.constant 0 : i32
    %13 = arith.cmpi eq, %arg1, %c0_i32 : i32
    %14 = arith.extui %13 : i1 to i32
    %c0_i32_6 = arith.constant 0 : i32
    %15 = arith.cmpi ne, %14, %c0_i32_6 : i32
    scf.if %15 {
      %cst_21 = arith.constant 0.000000e+00 : f32
      %38 = vector.broadcast %cst_21 : f32 to vector<8x1xf32>
      %c0_22 = arith.constant 0 : index
      %c0_23 = arith.constant 0 : index
      %39 = vector.load %arg3[%c0_22, %c0_23] : memref<8x1xf32, #tpu.memory_space<vmem>>, vector<8x1xf32>
      tpu.vector_store %arg3[%c0_22, %c0_23], %38 {strides = array<i32>} : memref<8x1xf32, #tpu.memory_space<vmem>>, vector<8x1xf32>,
      %cst_24 = arith.constant 0.000000e+00 : f32
      %40 = vector.broadcast %cst_24 : f32 to vector<8x1xf32>
      %c0_25 = arith.constant 0 : index
      %c0_26 = arith.constant 0 : index
      %41 = vector.load %arg4[%c0_25, %c0_26] : memref<8x1xf32, #tpu.memory_space<vmem>>, vector<8x1xf32>
      tpu.vector_store %arg4[%c0_25, %c0_26], %40 {strides = array<i32>} : memref<8x1xf32, #tpu.memory_space<vmem>>, vector<8x1xf32>,
    } else {
    }
    %c256_i32 = arith.constant 256 : i32
    %16 = arith.muli %arg1, %c256_i32 : i32
    %17 = arith.sitofp %16 : i32 to f32
    %cst_7 = arith.constant 2.560000e+02 : f32
    %18 = arith.addf %17, %cst_7 : f32
    %cst_8 = arith.constant 2.560000e+02 : f32
    %19 = arith.divf %cst_8, %18 : f32
    %c0_9 = arith.constant 0 : index
    %c0_10 = arith.constant 0 : index
    %20 = vector.load %arg3[%c0_9, %c0_10] : memref<8x1xf32, #tpu.memory_space<vmem>>, vector<8x1xf32>
    %21 = arith.subf %5, %20 : vector<8x1xf32>
    %c0_11 = arith.constant 0 : index
    %c0_12 = arith.constant 0 : index
    %22 = vector.load %arg3[%c0_11, %c0_12] : memref<8x1xf32, #tpu.memory_space<vmem>>, vector<8x1xf32>
    %23 = vector.broadcast %19 : f32 to vector<8x1xf32>
    %24 = arith.mulf %21, %23 : vector<8x1xf32>
    %25 = arith.addf %22, %24 : vector<8x1xf32>
    %c0_13 = arith.constant 0 : index
    %c0_14 = arith.constant 0 : index
    %26 = vector.load %arg3[%c0_13, %c0_14] : memref<8x1xf32, #tpu.memory_space<vmem>>, vector<8x1xf32>
    tpu.vector_store %arg3[%c0_13, %c0_14], %25 {strides = array<i32>} : memref<8x1xf32, #tpu.memory_space<vmem>>, vector<8x1xf32>,
    %c0_15 = arith.constant 0 : index
    %c0_16 = arith.constant 0 : index
    %27 = vector.load %arg4[%c0_15, %c0_16] : memref<8x1xf32, #tpu.memory_space<vmem>>, vector<8x1xf32>
    %28 = arith.addf %27, %12 : vector<8x1xf32>
    %29 = arith.mulf %21, %21 : vector<8x1xf32>
    %30 = arith.mulf %17, %19 : f32
    %31 = vector.broadcast %30 : f32 to vector<8x1xf32>
    %32 = arith.mulf %29, %31 : vector<8x1xf32>
    %33 = arith.addf %28, %32 : vector<8x1xf32>
    %c0_17 = arith.constant 0 : index
    %c0_18 = arith.constant 0 : index
    %34 = vector.load %arg4[%c0_17, %c0_18] : memref<8x1xf32, #tpu.memory_space<vmem>>, vector<8x1xf32>
    tpu.vector_store %arg4[%c0_17, %c0_18], %33 {strides = array<i32>} : memref<8x1xf32, #tpu.memory_space<vmem>>, vector<8x1xf32>,
    %c0_i32_19 = arith.constant 0 : i32
    %35 = arith.cmpi eq, %arg1, %c0_i32_19 : i32
    %36 = arith.extui %35 : i1 to i32
    %c0_i32_20 = arith.constant 0 : i32
    %37 = arith.cmpi ne, %36, %c0_i32_20 : i32
    scf.if %37 {
      %c0_21 = arith.constant 0 : index
      %c0_22 = arith.constant 0 : index
      %38 = vector.load %arg4[%c0_21, %c0_22] : memref<8x1xf32, #tpu.memory_space<vmem>>, vector<8x1xf32>
      %cst_23 = arith.constant 3.906250e-03 : f32
      %39 = vector.broadcast %cst_23 : f32 to vector<8x1xf32>
      %40 = arith.mulf %38, %39 : vector<8x1xf32>
      %cst_24 = arith.constant 9.99999974E-6 : f32
      %41 = vector.broadcast %cst_24 : f32 to vector<8x1xf32>
      %42 = arith.addf %40, %41 : vector<8x1xf32>
      %43 = math.rsqrt %42 : vector<8x1xf32>
      %c0_25 = arith.constant 0 : index
      %c0_26 = arith.constant 0 : index
      %44 = vector.load %arg4[%c0_25, %c0_26] : memref<8x1xf32, #tpu.memory_space<vmem>>, vector<8x1xf32>
      tpu.vector_store %arg4[%c0_25, %c0_26], %43 {strides = array<i32>} : memref<8x1xf32, #tpu.memory_space<vmem>>, vector<8x1xf32>,
    } else {
    }
    return
  }
  func.func @transform_0(%arg0: i32, %arg1: i32) -> (i32, i32, i32) {
    %c0_i32 = arith.constant 0 : i32
    %c0_i32_0 = arith.constant 0 : i32
    return %c0_i32, %arg0, %arg1 : i32, i32, i32
  }
  func.func @transform_1(%arg0: i32, %arg1: i32) -> (i32, i32) {
    %c0_i32 = arith.constant 0 : i32
    %c0_i32_0 = arith.constant 0 : i32
    return %arg0, %c0_i32 : i32, i32
  }
  func.func @transform_2(%arg0: i32, %arg1: i32) -> (i32, i32) {
    %c0_i32 = arith.constant 0 : i32
    %c0_i32_0 = arith.constant 0 : i32
    return %arg0, %c0_i32 : i32, i32
  }
}

module attributes {stable_mosaic.version = 11 : i64} {
  func.func @_norm_kernel(%arg0: i32, %arg1: i32, %arg2: memref<1x8x256xf32, #tpu.memory_space<vmem>>, %arg3: memref<8x1xf32, #tpu.memory_space<vmem>>, %arg4: memref<8x1xf32, #tpu.memory_space<vmem>>, %arg5: memref<1x8x256xf32, #tpu.memory_space<vmem>>) attributes {dimension_semantics = [#tpu.dimension_semantics<parallel>, #tpu.dimension_semantics<parallel>], iteration_bounds = array<i64: 1, 1>, scalar_prefetch = 0 : i64, scratch_operands = 0 : i64, tpu.core_type = #tpu.core_type<tc>, window_params = [{transform_indices = @transform_0, window_bounds = array<i64: 1, 8, 256>}, {transform_indices = @transform_1, window_bounds = array<i64: 8, 1>}, {transform_indices = @transform_2, window_bounds = array<i64: 8, 1>}, {transform_indices = @transform_3, window_bounds = array<i64: 1, 8, 256>}]} {
    %c0 = arith.constant 0 : index
    %c0_0 = arith.constant 0 : index
    %c0_1 = arith.constant 0 : index
    %0 = vector.load %arg2[%c0, %c0_0, %c0_1] : memref<1x8x256xf32, #tpu.memory_space<vmem>>, vector<1x8x256xf32>
    %c0_2 = arith.constant 0 : index
    %c0_3 = arith.constant 0 : index
    %1 = vector.load %arg3[%c0_2, %c0_3] : memref<8x1xf32, #tpu.memory_space<vmem>>, vector<8x1xf32>
    %2 = vector.shape_cast %1 : vector<8x1xf32> to vector<1x8x1xf32>
    %3 = vector.broadcast %2 : vector<1x8x1xf32> to vector<1x8x256xf32>
    %4 = arith.mulf %0, %3 : vector<1x8x256xf32>
    %c0_4 = arith.constant 0 : index
    %c0_5 = arith.constant 0 : index
    %5 = vector.load %arg4[%c0_4, %c0_5] : memref<8x1xf32, #tpu.memory_space<vmem>>, vector<8x1xf32>
    %6 = vector.shape_cast %5 : vector<8x1xf32> to vector<1x8x1xf32>
    %7 = vector.broadcast %6 : vector<1x8x1xf32> to vector<1x8x256xf32>
    %8 = arith.addf %4, %7 : vector<1x8x256xf32>
    %c0_6 = arith.constant 0 : index
    %c0_7 = arith.constant 0 : index
    %c0_8 = arith.constant 0 : index
    %9 = vector.load %arg5[%c0_6, %c0_7, %c0_8] : memref<1x8x256xf32, #tpu.memory_space<vmem>>, vector<1x8x256xf32>
    tpu.vector_store %arg5[%c0_6, %c0_7, %c0_8], %8 {strides = array<i32>} : memref<1x8x256xf32, #tpu.memory_space<vmem>>, vector<1x8x256xf32>,
    return
  }
  func.func @transform_0(%arg0: i32, %arg1: i32) -> (i32, i32, i32) {
    %c0_i32 = arith.constant 0 : i32
    %c0_i32_0 = arith.constant 0 : i32
    return %c0_i32, %arg0, %arg1 : i32, i32, i32
  }
  func.func @transform_1(%arg0: i32, %arg1: i32) -> (i32, i32) {
    %c0_i32 = arith.constant 0 : i32
    %c0_i32_0 = arith.constant 0 : i32
    return %arg0, %c0_i32 : i32, i32
  }
  func.func @transform_2(%arg0: i32, %arg1: i32) -> (i32, i32) {
    %c0_i32 = arith.constant 0 : i32
    %c0_i32_0 = arith.constant 0 : i32
    return %arg0, %c0_i32 : i32, i32
  }
  func.func @transform_3(%arg0: i32, %arg1: i32) -> (i32, i32, i32) {
    %c0_i32 = arith.constant 0 : i32
    %c0_i32_0 = arith.constant 0 : i32
    return %c0_i32, %arg0, %arg1 : i32, i32, i32
  }
}

</mosaic_0001>

<bundles_post_ra>
// kernel: ghost_bn2d_old.2
= control target key start
LH: loop header
LB: loop body
LE: loop exit
PB: predicated region body
PF: predicated region fallthrough
CT: control target
= control target key end

     0   :  { %vm30_vm0 = vcmask 7168   ;;  %v74_v2 = vmov 0.0   ;;  %s125_s0 = inlined_call_operand.vmem [shape: f32[1,8,256], index: 0, kind: input, shape index: {}]   ;;  %s126_s1 = inlined_call_operand.vmem [shape: f32[8,1], index: 1, kind: output, shape index: {0}]   ;;  %s127_s2 = inlined_call_operand.vmem [shape: f32[8,1], index: 2, kind: output, shape index: {1}]  }
   0x1   :  { %v10_v0 = vld [vmem:[%s125_s0] sm:$0xff]  ;;  %v11_v1 = vld [vmem:[%s125_s0 + $0x8] sm:$0xff]  ;;  %31 = vst.msk [vmem:[%s126_s1] sm:$0xff] %vm30_vm0, %v74_v2  ;;  %32 = vst.msk [vmem:[%s127_s2] sm:$0xff] %vm30_vm0, %v74_v2 }
   0x2   :  { %v12_v3 = vadd.f32 %v11_v1, %v10_v0 }
   0x4   :  { %13 = vadd.xlane.f32.xlu0 %v12_v3 }
   0x8   :  { %v40_v4 = vld [vmem:[%s126_s1] sm:$0xff] }
   0x9   :  { %v47_v15 = vld [vmem:[%s127_s2] sm:$0xff] }
  0x8d   :  { %v14_v5 = vpop.xlane.xlu0 %13 }
  0x8e   :  { %v17_v6 = vmul.f32 0.00390625, %v14_v5 }
  0x90   :  { %v41_v7 = vsub.f32 %v17_v6, %v40_v4  ;;  %v18_v8 = vsub.f32 %v10_v0, %v17_v6  ;;  %v19_v9 = vsub.f32 %v11_v1, %v17_v6 }
  0x92   :  { %v44_v10 = vadd.f32 %v41_v7, %v40_v4  ;;  %v20_v11 = vmul.f32 %v18_v8, %v18_v8  ;;  %v21_v12 = vmul.f32 %v19_v9, %v19_v9  ;;  %v49_v14 = vmul.f32 %v41_v7, %v41_v7 }
  0x94   :  { %46 = vst.msk [vmem:[%s126_s1] sm:$0xff] %vm30_vm0, %v44_v10  ;;  %v22_v13 = vadd.f32 %v21_v12, %v20_v11  ;;  %v52_v17 = vmul.f32 0.0, %v49_v14 }
  0x96   :  { %23 = vadd.xlane.f32.xlu0 %v22_v13 }
 0x11f   :  { %v24_v16 = vpop.xlane.xlu0 %23 }
 0x120   :  { %v48_v18 = vadd.f32 %v47_v15, %v24_v16 }
 0x122   :  { %v53_v19 = vadd.f32 %v52_v17, %v48_v18 }
 0x124   :  { %54 = vst.msk [vmem:[%s127_s2] sm:$0xff] %vm30_vm0, %v53_v19 }
 0x12b   :  { %v58_v20 = vld [vmem:[%s127_s2] sm:$0xff] }
 0x12c   :  { %v59_v21 = vmul.f32 0.00390625, %v58_v20 }
 0x12e   :  { %v60_v22 = vadd.f32 1e-05, %v59_v21 }
 0x130   :  { %72 = vrsqrt.f32 %v60_v22 }
 0x13d   :  { %v73_v23 = vpop.eup %72 }
 0x13e   :  { %62 = vst.msk [vmem:[%s127_s2] sm:$0xff] %vm30_vm0, %v73_v23 }

// kernel: ghost_bn2d_old.3
= control target key start
LH: loop header
LB: loop body
LE: loop exit
PB: predicated region body
PF: predicated region fallthrough
CT: control target
= control target key end

     0   :  { %v40_v0 = vmov 0   ;;  %s79_s1 = inlined_call_operand.vmem [shape: f32[8,1], index: 1, kind: input, shape index: {}]   ;;  %s80_s2 = inlined_call_operand.vmem [shape: f32[8,1], index: 2, kind: input, shape index: {}]   ;;  %s81_s0 = inlined_call_operand.vmem [shape: f32[1,8,256], index: 0, kind: input, shape index: {}]   ;;  %s82_s3 = inlined_call_operand.vmem [shape: f32[1,8,256], index: 3, kind: output, shape index: {}]  }
   0x1   :  { %39 = vset.pattern.permute.xlu0 %v40_v0  ;;  %v16_v1 = vld [vmem:[%s79_s1] sm:$0xff]  ;;  %v15_v5 = vld [vmem:[%s81_s0 + $0x8] sm:$0xff] }
   0x2   :  { %19 = vperm.xlu0 %39, %v16_v1   ;;  %v24_v2 = vld [vmem:[%s80_s2] sm:$0xff] }
   0x3   :  { %v14_v4 = vld [vmem:[%s81_s0] sm:$0xff] }
   0x6   :  { %27 = vperm.xlu0 %39, %v24_v2  }
  0x7d   :  { %v20_v3 = vpop.permute.xlu0 %19 }
  0x7e   :  { %v22_v6 = vmul.f32 %v20_v3, %v14_v4  ;;  %v23_v7 = vmul.f32 %v20_v3, %v15_v5 }
  0x81   :  { %v28_v8 = vpop.permute.xlu0 %27 }
  0x82   :  { %v30_v9 = vadd.f32 %v28_v8, %v22_v6  ;;  %v31_v10 = vadd.f32 %v28_v8, %v23_v7 }
  0x84   :  { %32 = vst [vmem:[%s82_s3] sm:$0xff] %v30_v9  ;;  %33 = vst [vmem:[%s82_s3 + $0x8] sm:$0xff] %v31_v10 }

</bundles_post_ra>
